<compile_context>
chip_gen: v5e
topology: v5e:2x2
jax: 0.10.0
libtpu: 0.0.40
codegen_flags: <defaults>
</compile_context>

<pallas_src>
import numpy as np
import jax
import jax.numpy as jnp
from jax.experimental import pallas as pl
from jax.experimental.pallas import tpu as pltpu

LANE = 128
SUB = 8                    # sublanes per f32 vreg
SUBBLOCK = SUB * LANE      # 1024 elements = one (8,128) tile


def _make_dice_kernel(tb, tile_rows, r_total, needs_mask):
    """Partial-sum kernel over a (tb samples, tile_rows rows, 128 lanes) block."""
    groups = tile_rows // SUB  # tile_rows is always a multiple of 8

    def _accum(p, t, inter_ref, psum_ref, tsum_ref):
        # (tb, tile_rows, 128) -> (tb, groups, 8, 128); summing over `groups`
        # is pure VPU vreg adds (no XLU), result stays vreg-shaped (tb,8,128).
        inter_ref[...] += jnp.sum((p * t).reshape(tb, groups, SUB, LANE), axis=1)
        psum_ref[...] += jnp.sum(p.reshape(tb, groups, SUB, LANE), axis=1)
        tsum_ref[...] += jnp.sum(t.reshape(tb, groups, SUB, LANE), axis=1)

    def kernel(pred_ref, target_ref, inter_ref, psum_ref, tsum_ref):
        k = pl.program_id(1)

        @pl.when(k == 0)
        def _init():
            inter_ref[...] = jnp.zeros_like(inter_ref)
            psum_ref[...] = jnp.zeros_like(psum_ref)
            tsum_ref[...] = jnp.zeros_like(tsum_ref)

        p = pred_ref[...].astype(jnp.float32)    # (tb, tile_rows, 128)
        t = target_ref[...].astype(jnp.float32)  # (tb, tile_rows, 128)

        if needs_mask:
            # Only the last row-tile can be partial; gate the mask so full
            # tiles do no extra VPU work.  (needs_mask path only when tb==1.)
            last = pl.num_programs(1) - 1

            @pl.when(k != last)
            def _full():
                _accum(p, t, inter_ref, psum_ref, tsum_ref)

            @pl.when(k == last)
            def _tail():
                rows = jax.lax.broadcasted_iota(jnp.int32, (tb, tile_rows, LANE), 1)
                valid = rows < (r_total - k * tile_rows)
                _accum(jnp.where(valid, p, 0.0), jnp.where(valid, t, 0.0),
                       inter_ref, psum_ref, tsum_ref)
        else:
            _accum(p, t, inter_ref, psum_ref, tsum_ref)

    return kernel


def dice_loss(pred, target, *, tile_rows=4096):
    """Pallas TPU implementation of DiceLoss.forward(pred, target)."""
    assert pred.shape == target.shape
    smooth = 1.0
    B = pred.shape[0]
    N = int(np.prod(pred.shape[1:])) if pred.ndim > 1 else 1

    # Flatten per sample (matches torch .view(size, -1)); keep input dtype.
    p2 = pred.reshape(B, N)
    t2 = target.reshape(B, N)

    # The kernel consumes only the 1024-aligned prefix (R rows of 128 lanes,
    # R a multiple of 8).  The <1024-element per-sample tail, if any, is
    # summed in the tiny JAX epilogue — no full-array pad copy.
    n_main = (N // SUBBLOCK) * SUBBLOCK
    if n_main == 0:
        # Degenerate tiny sample: pad up to one (8,128) tile (negligible).
        pad = SUBBLOCK - N
        p_main = jnp.pad(p2, ((0, 0), (0, pad)))
        t_main = jnp.pad(t2, ((0, 0), (0, pad)))
        n_main, tail = SUBBLOCK, 0
    else:
        tail = N - n_main
        p_main = p2[:, :n_main] if tail else p2
        t_main = t2[:, :n_main] if tail else t2

    R = n_main // LANE  # always a multiple of 8
    p3 = p_main.reshape(B, R, LANE)
    t3 = t_main.reshape(B, R, LANE)

    # Rows-per-step budget: multiple of 8, capped so 2 inputs x 2 pipeline
    # buffers stays well inside scoped VMEM on all generations.
    budget_rows = max(SUB, (min(int(tile_rows), 8192) // SUB) * SUB)

    if R <= budget_rows:
        # Whole sample fits in one step: batch several samples per grid step
        # to amortize the fixed per-step overhead.
        tr = R
        tb = 1
        cap = max(1, budget_rows // R)
        for d in range(min(B, cap), 0, -1):
            if B % d == 0:
                tb = d
                break
        n_k = 1
        needs_mask = False
    else:
        tr = budget_rows
        tb = 1
        n_k = pl.cdiv(R, tr)
        needs_mask = (R % tr) != 0
    n_b = B // tb

    kernel = _make_dice_kernel(tb, tr, R, needs_mask)

    acc_shape = jax.ShapeDtypeStruct((B, SUB, LANE), jnp.float32)
    acc_spec = pl.BlockSpec((tb, SUB, LANE), lambda b, k: (b, 0, 0))
    in_spec = pl.BlockSpec((tb, tr, LANE), lambda b, k: (b, k, 0))

    inter_b, psum_b, tsum_b = pl.pallas_call(
        kernel,
        out_shape=(acc_shape, acc_shape, acc_shape),
        grid=(n_b, n_k),
        in_specs=[in_spec, in_spec],
        out_specs=[acc_spec, acc_spec, acc_spec],
        compiler_params=pltpu.CompilerParams(
            dimension_semantics=("parallel", "arbitrary"),
            vmem_limit_bytes=32 * 1024 * 1024,
        ),
    )(p3, t3)

    # O(B) epilogue in plain JAX: deferred sublane/lane reduce + tail + dice.
    inter = jnp.sum(inter_b, axis=(1, 2))
    p_sum = jnp.sum(psum_b, axis=(1, 2))
    t_sum = jnp.sum(tsum_b, axis=(1, 2))

    if tail:
        p_t = p2[:, n_main:].astype(jnp.float32)
        t_t = t2[:, n_main:].astype(jnp.float32)
        inter = inter + jnp.sum(p_t * t_t, axis=1)
        p_sum = p_sum + jnp.sum(p_t, axis=1)
        t_sum = t_sum + jnp.sum(t_t, axis=1)

    dice_score = (2.0 * inter + smooth) / (p_sum + t_sum + smooth)
    return 1.0 - jnp.sum(dice_score) / B


def _dice_loss_ref(pred, target):
    smooth = 1.0
    B = pred.shape[0]
    p = pred.reshape(B, -1).astype(jnp.float32)
    t = target.reshape(B, -1).astype(jnp.float32)
    inter = jnp.sum(p * t, axis=1)
    score = (2.0 * inter + smooth) / (jnp.sum(p, axis=1) + jnp.sum(t, axis=1) + smooth)
    return 1.0 - jnp.sum(score) / B


if __name__ == "__main__":
    key = jax.random.PRNGKey(0)

    def check(pred, target, **kw):
        loss = dice_loss(pred, target, **kw)
        jax.block_until_ready(loss)
        ref = _dice_loss_ref(pred, target)
        assert jnp.allclose(loss, ref, rtol=1e-5, atol=1e-5), (loss, ref)

    # Case 1: main small NCHW case (B=2, C=4, 16x16), N=1024 -> batched
    # small-sample path (TB=2 samples per grid step).
    k1, k2, key = jax.random.split(key, 3)
    pred = jax.nn.sigmoid(jax.random.normal(k1, (2, 4, 16, 16), dtype=jnp.float32))
    target = (jax.random.uniform(k2, (2, 4, 16, 16)) > 0.5).astype(jnp.float32)
    check(pred, target)

    # Case 2: tiny unaligned N (C=3, 7x5 -> N=105) -> pad-to-one-tile fallback.
    k1, k2, key = jax.random.split(key, 3)
    pred2 = jax.nn.sigmoid(jax.random.normal(k1, (2, 3, 7, 5), dtype=jnp.float32))
    target2 = (jax.random.uniform(k2, (2, 3, 7, 5)) > 0.5).astype(jnp.float32)
    check(pred2, target2)

    # Case 3: N=1296 -> 1024-element kernel prefix + 272-element JAX tail.
    k1, k2, key = jax.random.split(key, 3)
    pred3 = jax.nn.sigmoid(jax.random.normal(k1, (2, 4, 18, 18), dtype=jnp.float32))
    target3 = (jax.random.uniform(k2, (2, 4, 18, 18)) > 0.5).astype(jnp.float32)
    check(pred3, target3)

    # Case 4: N=9216 (R=72), tile_rows=16 -> multi-step reduction with a
    # masked partial last row-tile (exercises the pl.when-gated mask path).
    k1, k2, key = jax.random.split(key, 3)
    pred4 = jax.nn.sigmoid(jax.random.normal(k1, (1, 4, 48, 48), dtype=jnp.float32))
    target4 = (jax.random.uniform(k2, (1, 4, 48, 48)) > 0.5).astype(jnp.float32)
    check(pred4, target4, tile_rows=16)

    # Case 5: N=2048 (R=16), tile_rows=8 -> multi-step reduction, no mask.
    k1, k2, key = jax.random.split(key, 3)
    pred5 = jax.nn.sigmoid(jax.random.normal(k1, (2, 4, 16, 32), dtype=jnp.float32))
    target5 = (jax.random.uniform(k2, (2, 4, 16, 32)) > 0.5).astype(jnp.float32)
    check(pred5, target5, tile_rows=8)

    # Case 6: bf16 inputs stay bf16 through the DMA; kernel casts to f32.
    k1, k2, key = jax.random.split(key, 3)
    pred6 = jax.nn.sigmoid(jax.random.normal(k1, (2, 4, 16, 16))).astype(jnp.bfloat16)
    target6 = (jax.random.uniform(k2, (2, 4, 16, 16)) > 0.5).astype(jnp.bfloat16)
    check(pred6, target6)

    print("KERNEL_OK")
</pallas_src>

<mosaic_0001>
module attributes {stable_mosaic.version = 11 : i64} {
  func.func @kernel(%arg0: i32, %arg1: i32, %arg2: memref<2x8x128xf32, #tpu.memory_space<vmem>>, %arg3: memref<2x8x128xf32, #tpu.memory_space<vmem>>, %arg4: memref<2x8x128xf32, #tpu.memory_space<vmem>>, %arg5: memref<2x8x128xf32, #tpu.memory_space<vmem>>, %arg6: memref<2x8x128xf32, #tpu.memory_space<vmem>>) attributes {dimension_semantics = [#tpu.dimension_semantics<parallel>, #tpu.dimension_semantics<arbitrary>], iteration_bounds = array<i64: 1, 1>, scalar_prefetch = 0 : i64, scratch_operands = 0 : i64, tpu.core_type = #tpu.core_type<tc>, window_params = [{transform_indices = @transform_0, window_bounds = array<i64: 2, 8, 128>}, {transform_indices = @transform_1, window_bounds = array<i64: 2, 8, 128>}, {transform_indices = @transform_2, window_bounds = array<i64: 2, 8, 128>}, {transform_indices = @transform_3, window_bounds = array<i64: 2, 8, 128>}, {transform_indices = @transform_4, window_bounds = array<i64: 2, 8, 128>}]} {
    %c0_i32 = arith.constant 0 : i32
    %0 = arith.cmpi eq, %arg1, %c0_i32 : i32
    %1 = arith.extui %0 : i1 to i32
    %c0_i32_0 = arith.constant 0 : i32
    %2 = arith.cmpi ne, %1, %c0_i32_0 : i32
    scf.if %2 {
      %cst_26 = arith.constant 0.000000e+00 : f32
      %21 = vector.broadcast %cst_26 : f32 to vector<2x8x128xf32>
      %c0_27 = arith.constant 0 : index
      %c0_28 = arith.constant 0 : index
      %c0_29 = arith.constant 0 : index
      %22 = vector.load %arg4[%c0_27, %c0_28, %c0_29] : memref<2x8x128xf32, #tpu.memory_space<vmem>>, vector<2x8x128xf32>
      tpu.vector_store %arg4[%c0_27, %c0_28, %c0_29], %21 {strides = array<i32>} : memref<2x8x128xf32, #tpu.memory_space<vmem>>, vector<2x8x128xf32>,
      %cst_30 = arith.constant 0.000000e+00 : f32
      %23 = vector.broadcast %cst_30 : f32 to vector<2x8x128xf32>
      %c0_31 = arith.constant 0 : index
      %c0_32 = arith.constant 0 : index
      %c0_33 = arith.constant 0 : index
      %24 = vector.load %arg5[%c0_31, %c0_32, %c0_33] : memref<2x8x128xf32, #tpu.memory_space<vmem>>, vector<2x8x128xf32>
      tpu.vector_store %arg5[%c0_31, %c0_32, %c0_33], %23 {strides = array<i32>} : memref<2x8x128xf32, #tpu.memory_space<vmem>>, vector<2x8x128xf32>,
      %cst_34 = arith.constant 0.000000e+00 : f32
      %25 = vector.broadcast %cst_34 : f32 to vector<2x8x128xf32>
      %c0_35 = arith.constant 0 : index
      %c0_36 = arith.constant 0 : index
      %c0_37 = arith.constant 0 : index
      %26 = vector.load %arg6[%c0_35, %c0_36, %c0_37] : memref<2x8x128xf32, #tpu.memory_space<vmem>>, vector<2x8x128xf32>
      tpu.vector_store %arg6[%c0_35, %c0_36, %c0_37], %25 {strides = array<i32>} : memref<2x8x128xf32, #tpu.memory_space<vmem>>, vector<2x8x128xf32>,
    } else {
    }
    %c0 = arith.constant 0 : index
    %c0_1 = arith.constant 0 : index
    %c0_2 = arith.constant 0 : index
    %3 = vector.load %arg2[%c0, %c0_1, %c0_2] : memref<2x8x128xf32, #tpu.memory_space<vmem>>, vector<2x8x128xf32>
    %c0_3 = arith.constant 0 : index
    %c0_4 = arith.constant 0 : index
    %c0_5 = arith.constant 0 : index
    %4 = vector.load %arg3[%c0_3, %c0_4, %c0_5] : memref<2x8x128xf32, #tpu.memory_space<vmem>>, vector<2x8x128xf32>
    %c0_6 = arith.constant 0 : index
    %c0_7 = arith.constant 0 : index
    %c0_8 = arith.constant 0 : index
    %5 = vector.load %arg4[%c0_6, %c0_7, %c0_8] : memref<2x8x128xf32, #tpu.memory_space<vmem>>, vector<2x8x128xf32>
    %6 = arith.mulf %3, %4 : vector<2x8x128xf32>
    %7 = vector.shape_cast %6 : vector<2x8x128xf32> to vector<2x1x8x128xf32>
    %cst = arith.constant dense<0.000000e+00> : vector<2x8x128xf32>
    %8 = vector.multi_reduction <add>, %7, %cst [1] : vector<2x1x8x128xf32> to vector<2x8x128xf32>
    %9 = arith.addf %5, %8 : vector<2x8x128xf32>
    %c0_9 = arith.constant 0 : index
    %c0_10 = arith.constant 0 : index
    %c0_11 = arith.constant 0 : index
    %10 = vector.load %arg4[%c0_9, %c0_10, %c0_11] : memref<2x8x128xf32, #tpu.memory_space<vmem>>, vector<2x8x128xf32>
    tpu.vector_store %arg4[%c0_9, %c0_10, %c0_11], %9 {strides = array<i32>} : memref<2x8x128xf32, #tpu.memory_space<vmem>>, vector<2x8x128xf32>,
    %c0_12 = arith.constant 0 : index
    %c0_13 = arith.constant 0 : index
    %c0_14 = arith.constant 0 : index
    %11 = vector.load %arg5[%c0_12, %c0_13, %c0_14] : memref<2x8x128xf32, #tpu.memory_space<vmem>>, vector<2x8x128xf32>
    %12 = vector.shape_cast %3 : vector<2x8x128xf32> to vector<2x1x8x128xf32>
    %cst_15 = arith.constant dense<0.000000e+00> : vector<2x8x128xf32>
    %13 = vector.multi_reduction <add>, %12, %cst_15 [1] : vector<2x1x8x128xf32> to vector<2x8x128xf32>
    %14 = arith.addf %11, %13 : vector<2x8x128xf32>
    %c0_16 = arith.constant 0 : index
    %c0_17 = arith.constant 0 : index
    %c0_18 = arith.constant 0 : index
    %15 = vector.load %arg5[%c0_16, %c0_17, %c0_18] : memref<2x8x128xf32, #tpu.memory_space<vmem>>, vector<2x8x128xf32>
    tpu.vector_store %arg5[%c0_16, %c0_17, %c0_18], %14 {strides = array<i32>} : memref<2x8x128xf32, #tpu.memory_space<vmem>>, vector<2x8x128xf32>,
    %c0_19 = arith.constant 0 : index
    %c0_20 = arith.constant 0 : index
    %c0_21 = arith.constant 0 : index
    %16 = vector.load %arg6[%c0_19, %c0_20, %c0_21] : memref<2x8x128xf32, #tpu.memory_space<vmem>>, vector<2x8x128xf32>
    %17 = vector.shape_cast %4 : vector<2x8x128xf32> to vector<2x1x8x128xf32>
    %cst_22 = arith.constant dense<0.000000e+00> : vector<2x8x128xf32>
    %18 = vector.multi_reduction <add>, %17, %cst_22 [1] : vector<2x1x8x128xf32> to vector<2x8x128xf32>
    %19 = arith.addf %16, %18 : vector<2x8x128xf32>
    %c0_23 = arith.constant 0 : index
    %c0_24 = arith.constant 0 : index
    %c0_25 = arith.constant 0 : index
    %20 = vector.load %arg6[%c0_23, %c0_24, %c0_25] : memref<2x8x128xf32, #tpu.memory_space<vmem>>, vector<2x8x128xf32>
    tpu.vector_store %arg6[%c0_23, %c0_24, %c0_25], %19 {strides = array<i32>} : memref<2x8x128xf32, #tpu.memory_space<vmem>>, vector<2x8x128xf32>,
    return
  }
  func.func @transform_0(%arg0: i32, %arg1: i32) -> (i32, i32, i32) {
    %c0_i32 = arith.constant 0 : i32
    %c0_i32_0 = arith.constant 0 : i32
    return %arg0, %arg1, %c0_i32 : i32, i32, i32
  }
  func.func @transform_1(%arg0: i32, %arg1: i32) -> (i32, i32, i32) {
    %c0_i32 = arith.constant 0 : i32
    %c0_i32_0 = arith.constant 0 : i32
    return %arg0, %arg1, %c0_i32 : i32, i32, i32
  }
  func.func @transform_2(%arg0: i32, %arg1: i32) -> (i32, i32, i32) {
    %c0_i32 = arith.constant 0 : i32
    %c0_i32_0 = arith.constant 0 : i32
    %c0_i32_1 = arith.constant 0 : i32
    return %arg0, %c0_i32, %c0_i32_0 : i32, i32, i32
  }
  func.func @transform_3(%arg0: i32, %arg1: i32) -> (i32, i32, i32) {
    %c0_i32 = arith.constant 0 : i32
    %c0_i32_0 = arith.constant 0 : i32
    %c0_i32_1 = arith.constant 0 : i32
    return %arg0, %c0_i32, %c0_i32_0 : i32, i32, i32
  }
  func.func @transform_4(%arg0: i32, %arg1: i32) -> (i32, i32, i32) {
    %c0_i32 = arith.constant 0 : i32
    %c0_i32_0 = arith.constant 0 : i32
    %c0_i32_1 = arith.constant 0 : i32
    return %arg0, %c0_i32, %c0_i32_0 : i32, i32, i32
  }
}

</mosaic_0001>

<bundles_post_ra>
// kernel: tpu_custom_call.1
= control target key start
LH: loop header
LB: loop body
LE: loop exit
PB: predicated region body
PF: predicated region fallthrough
CT: control target
= control target key end

     0   :  { %10 = vsyncpa [#allocation3], 0  ;;  %s341_s0 = inlined_call_operand.hbm [shape: f32[2,8,128], index: 0, kind: input, shape index: {}]   ;;  %s342_s1 = inlined_call_operand.hbm [shape: f32[2,8,128], index: 1, kind: input, shape index: {}]   ;;  %s343_s2 = inlined_call_operand.hbm [shape: f32[2,8,128], index: 2, kind: output, shape index: {0}]   ;;  %s344_s3 = inlined_call_operand.hbm [shape: f32[2,8,128], index: 3, kind: output, shape index: {1}]   ;;  %s345_s4 = inlined_call_operand.hbm [shape: f32[2,8,128], index: 4, kind: output, shape index: {2}]  }
   0x1   :  { %11 = vsyncpa [#allocation6], 0 }
   0x2   :  { %12 = vsyncpa [#allocation4], 0 }
   0x3   :  { %13 = vsyncpa [#allocation9], 0  ;;  %s18_s17 = sshll.u32 %s341_s0, 4  ;;  %s279_s18 = smov [#allocation2]   ;;  %s19_s17 = int_to_ptr.hbm [resolvable:$true] %s18_s17 }
   0x4   :  { %s20_s19 = sshll.u32 %s279_s18, 4  ;;  %s31_s22 = sshll.u32 %s342_s1, 4  ;;  %s21_s19 = int_to_ptr.vmem [resolvable:$true] %s20_s19  ;;  %s32_s22 = int_to_ptr.hbm [resolvable:$true] %s31_s22 }
   0x5   :  { %s280_s23 = smov 128   ;;  %s281_s24 = smov 8  }
   0x6   :  { %26 = dma.hbm_to_vmem [thread:$0]  %s19_s17, 256, %s21_s19, [#allocation3], %s280_s23, %s280_s23, %s281_s24  }
   0x7   :  { %s282_s25 = smov [#allocation5]  }
   0x8   :  { %s33_s26 = sshll.u32 %s282_s25, 4  ;;  %s34_s26 = int_to_ptr.vmem [resolvable:$true] %s33_s26 }
   0x9   :  { %39 = dma.hbm_to_vmem [thread:$0]  %s32_s22, 256, %s34_s26, [#allocation6], %s280_s23, %s280_s23, %s281_s24  }
   0xa   :  { %271 = dma.done.wait [#allocation3], 256  }
   0xb   :  { %272 = vsyncadd [#allocation3], 4294967040 }
   0xc   :  { %273 = dma.done.wait [#allocation6], 256  }
   0xd   :  { %274 = vsyncadd [#allocation6], 4294967040  ;;  %s283_s0 = smov [#allocation8]   ;;  %s107_s29 = sshll.u32 %s344_s3, 4  ;;  %v58_v0 = vld [vmem:[#allocation2] sm:$0xff]  ;;  %v59_v1 = vld [vmem:[#allocation2 + $0x8] sm:$0xff]  ;;  %s108_s29 = int_to_ptr.hbm [resolvable:$true] %s107_s29 }
   0xe   :  { %s105_s1 = sshll.u32 %s283_s0, 4  ;;  %v60_v2 = vld [vmem:[#allocation5] sm:$0xff]  ;;  %v61_v4 = vld [vmem:[#allocation5 + $0x8] sm:$0xff]  ;;  %s284_s30 = smov [#allocation7]   ;;  %78 = vst [vmem:[#allocation8] sm:$0xff] %v58_v0  ;;  %s106_s1 = int_to_ptr.vmem [resolvable:$true] %s105_s1 }
   0xf   :  { %v64_v3 = vmul.f32 %v60_v2, %v58_v0  ;;  %s92_s5 = sshll.u32 %s284_s30, 4  ;;  %s94_s8 = sshll.u32 %s343_s2, 4  ;;  %v65_v5 = vmul.f32 %v61_v4, %v59_v1  ;;  %79 = vst [vmem:[#allocation8 + $0x8] sm:$0xff] %v59_v1  ;;  %s93_s5 = int_to_ptr.vmem [resolvable:$true] %s92_s5  ;;  %s95_s8 = int_to_ptr.hbm [resolvable:$true] %s94_s8 }
  0x10   :  { %s285_s9 = smov [#allocation10]   ;;  %s120_s3 = sshll.u32 %s345_s4, 4  ;;  %86 = vst [vmem:[#allocation10] sm:$0xff] %v60_v2  ;;  %s121_s3 = int_to_ptr.hbm [resolvable:$true] %s120_s3 }
  0x11   :  { %s118_s10 = sshll.u32 %s285_s9, 4  ;;  %70 = vst [vmem:[#allocation7] sm:$0xff] %v64_v3  ;;  %s119_s10 = int_to_ptr.vmem [resolvable:$true] %s118_s10 }
  0x12   :  { %113 = dma.vmem_to_hbm [thread:$0]  %s106_s1, 256, %s108_s29, [#allocation9], %s280_s23, %s280_s23, %s281_s24   ;;  %71 = vst [vmem:[#allocation7 + $0x8] sm:$0xff] %v65_v5 }
  0x13   :  { %100 = dma.vmem_to_hbm [thread:$0]  %s93_s5, 256, %s95_s8, [#allocation4], %s280_s23, %s280_s23, %s281_s24   ;;  %87 = vst [vmem:[#allocation10 + $0x8] sm:$0xff] %v61_v4 }
  0x14   :  { %126 = dma.vmem_to_hbm [thread:$0]  %s119_s10, 256, %s121_s3, [#allocation9], %s280_s23, %s280_s23, %s281_s24  }
  0x15   :  { %275 = dma.done.wait [#allocation4], 256  }
  0x16   :  { %276 = vsyncadd [#allocation4], 4294967040 }
  0x17   :  { %277 = dma.done.wait [#allocation9], 512  }
  0x18   :  { %278 = vsyncadd [#allocation9], 4294966784 }
  0x19   :  { %139 = vsyncpa [#allocation3], 1 }
  0x1a   :  { %140 = vsyncpa [#allocation6], 1 }
  0x1b   :  { %141 = vsyncpa [#allocation4], 1 }
  0x1c   :  { %142 = vsyncpa [#allocation9], 1 }

</bundles_post_ra>
